<compile_context>
chip_gen: v7x
topology: tpu7x:2x2x1
jax: 0.10.0
libtpu: 0.0.40
codegen_flags: <defaults>
</compile_context>

<pallas_src>
import jax
import jax.numpy as jnp
from jax.experimental import pallas as pl
from jax.experimental.pallas import tpu as pltpu


def _round_up(x, m):
    return ((x + m - 1) // m) * m


def _weighted_ce_kernel(x_ref, t_ref, w_ref, out_ref, num_acc, den_acc):
    """One batch tile of weighted cross-entropy.

    x_ref:   (TN, C) logits (native dtype) in VMEM
    t_ref:   (TN, 1) int32 targets (out-of-range => zero contribution)
    w_ref:   (1, C)  f32 class weights (block index constant => stays resident)
    out_ref: (1, 1)  f32 final loss, written on the last grid step
    num_acc, den_acc: (1, 1) f32 VMEM scratch accumulators
    """
    i = pl.program_id(0)

    @pl.when(i == 0)
    def _():
        num_acc[...] = jnp.zeros_like(num_acc)
        den_acc[...] = jnp.zeros_like(den_acc)

    x = x_ref[...].astype(jnp.float32)   # in-kernel cast: free VPU work, no HBM cost
    t = t_ref[...]
    w = w_ref[...].astype(jnp.float32)
    tn, c = x.shape

    # Numerically stable log-sum-exp per row.
    m = jnp.max(x, axis=1, keepdims=True)                                # (TN, 1)
    lse = m + jnp.log(jnp.sum(jnp.exp(x - m), axis=1, keepdims=True))    # (TN, 1)

    # Fused one-hot pick: masked_w[i, j] = weight[j] if j == target[i] else 0.
    cls = jax.lax.broadcasted_iota(jnp.int32, (tn, c), 1)                # (TN, C)
    masked_w = jnp.where(cls == t, w, 0.0)                               # (TN, C)

    # loss_i = w[t_i] * (lse_i - x[i, t_i]); mean = sum(loss) / sum(w[t_i]).
    row_num = jnp.sum(masked_w * (lse - x), axis=1, keepdims=True)       # (TN, 1)
    row_den = jnp.sum(masked_w, axis=1, keepdims=True)                   # (TN, 1)
    num_acc[...] += jnp.sum(row_num, axis=0, keepdims=True)              # (1, 1)
    den_acc[...] += jnp.sum(row_den, axis=0, keepdims=True)              # (1, 1)

    @pl.when(i == pl.num_programs(0) - 1)
    def _():
        # NaN if total selected weight is 0 (matches PyTorch mean reduction).
        out_ref[...] = num_acc[...] / den_acc[...]


def label_criterion(logits, target, weight, *, block_rows=None):
    """JAX wrapper: F.cross_entropy(logits, target, weight=weight) (mean)."""
    n, c = logits.shape
    itemsize = jnp.dtype(logits.dtype).itemsize

    if block_rows is None:
        # ~4 MiB logits tile: double-buffered (~8 MiB) fits the default scoped
        # VMEM on every generation (v5e 16 MiB, v6e 32 MiB, v7x 32 of 64 MiB)
        # while still amortizing the ~0.35 us per-grid-step overhead.
        target_tile_bytes = 4 * 1024 * 1024
        block_rows = max(8, min(1024, target_tile_bytes // max(c * itemsize, 1)))
    block_rows = int(min(block_rows, _round_up(n, 8)))
    block_rows = max(8, (block_rows // 8) * 8)

    n_pad = _round_up(n, block_rows)
    t2 = target.astype(jnp.int32)
    if n_pad != n:
        # Padded rows get target = -1 -> zero weight -> zero contribution.
        logits = jnp.pad(logits, ((0, n_pad - n), (0, 0)))
        t2 = jnp.pad(t2, ((0, n_pad - n),), constant_values=-1)
    t2 = t2.reshape(n_pad, 1)
    w2 = weight.astype(jnp.float32).reshape(1, c)

    grid = (n_pad // block_rows,)
    out = pl.pallas_call(
        _weighted_ce_kernel,
        out_shape=jax.ShapeDtypeStruct((1, 1), jnp.float32),
        grid_spec=pltpu.PrefetchScalarGridSpec(
            num_scalar_prefetch=0,
            grid=grid,
            in_specs=[
                pl.BlockSpec((block_rows, c), lambda i: (i, 0)),   # logits tile
                pl.BlockSpec((block_rows, 1), lambda i: (i, 0)),   # target tile
                pl.BlockSpec((1, c), lambda i: (0, 0)),            # weights (resident)
            ],
            out_specs=pl.BlockSpec((1, 1), lambda i: (0, 0)),
            scratch_shapes=[
                pltpu.VMEM((1, 1), jnp.float32),   # num accumulator
                pltpu.VMEM((1, 1), jnp.float32),   # den accumulator
            ],
        ),
        compiler_params=pltpu.CompilerParams(
            # Output-resident accumulator across the batch axis => "arbitrary".
            dimension_semantics=("arbitrary",),
        ),
    )(logits, t2, w2)
    return out[0, 0]


def _reference(logits, target, weight):
    """Pure-JAX reference for sanity checking."""
    logp = jax.nn.log_softmax(logits.astype(jnp.float32), axis=-1)
    picked = jnp.take_along_axis(logp, target[:, None].astype(jnp.int32), axis=-1)[:, 0]
    w_t = weight.astype(jnp.float32)[target]
    return jnp.sum(-w_t * picked) / jnp.sum(w_t)


if __name__ == "__main__":
    key = jax.random.PRNGKey(0)
    k1, k2, k3, k4, k5, k6 = jax.random.split(key, 6)

    # Case 1: small f32 problem, single tile.
    n, c = 8, 32
    logits = jax.random.normal(k1, (n, c), dtype=jnp.float32)
    target = jax.random.randint(k2, (n,), 0, c, dtype=jnp.int32)
    weight = jax.random.uniform(k3, (c,), dtype=jnp.float32, minval=0.5, maxval=1.5)

    loss = label_criterion(logits, target, weight)
    jax.block_until_ready(loss)
    ref = _reference(logits, target, weight)
    assert jnp.allclose(loss, ref, rtol=1e-5, atol=1e-5), (loss, ref)

    # Case 2: bf16 logits (no wrapper up-cast), batch not a multiple of the tile
    # -> exercises row padding and multi-step grid accumulation.
    n2, c2 = 20, 160
    logits2 = jax.random.normal(k4, (n2, c2), dtype=jnp.bfloat16)
    target2 = jax.random.randint(k5, (n2,), 0, c2, dtype=jnp.int32)
    weight2 = jax.random.uniform(k6, (c2,), dtype=jnp.float32, minval=0.5, maxval=1.5)

    loss2 = label_criterion(logits2, target2, weight2, block_rows=16)  # grid of 2
    jax.block_until_ready(loss2)
    ref2 = _reference(logits2, target2, weight2)
    assert jnp.allclose(loss2, ref2, rtol=1e-4, atol=1e-4), (loss2, ref2)

    print("KERNEL_OK")
</pallas_src>

<mosaic_0001>
module attributes {stable_mosaic.version = 11 : i64} {
  func.func @_weighted_ce_kernel(%arg0: i32, %arg1: memref<8x32xf32, #tpu.memory_space<vmem>>, %arg2: memref<8x1xi32, #tpu.memory_space<vmem>>, %arg3: memref<1x32xf32, #tpu.memory_space<vmem>>, %arg4: memref<1x1xf32, #tpu.memory_space<vmem>>, %arg5: memref<1x1xf32, #tpu.memory_space<vmem>>, %arg6: memref<1x1xf32, #tpu.memory_space<vmem>>) attributes {dimension_semantics = [#tpu.dimension_semantics<arbitrary>], iteration_bounds = array<i64: 1>, scalar_prefetch = 0 : i64, scratch_operands = 2 : i64, tpu.core_type = #tpu.core_type<tc>, window_params = [{transform_indices = @transform_0, window_bounds = array<i64: 8, 32>}, {transform_indices = @transform_1, window_bounds = array<i64: 8, 1>}, {pipeline_mode = #tpu.pipeline_mode<synchronous>, transform_indices = @transform_2, window_bounds = array<i64: 1, 32>}, {pipeline_mode = #tpu.pipeline_mode<synchronous>, transform_indices = @transform_3, window_bounds = array<i64: 1, 1>}]} {
    %c0_i32 = arith.constant 0 : i32
    %0 = arith.cmpi eq, %arg0, %c0_i32 : i32
    %1 = arith.extui %0 : i1 to i32
    %c0_i32_0 = arith.constant 0 : i32
    %2 = arith.cmpi ne, %1, %c0_i32_0 : i32
    scf.if %2 {
      %cst_22 = arith.constant 0.000000e+00 : f32
      %42 = vector.broadcast %cst_22 : f32 to vector<1x1xf32>
      %c0_23 = arith.constant 0 : index
      %c0_24 = arith.constant 0 : index
      %43 = vector.load %arg5[%c0_23, %c0_24] : memref<1x1xf32, #tpu.memory_space<vmem>>, vector<1x1xf32>
      tpu.vector_store %arg5[%c0_23, %c0_24], %42 {strides = array<i32>} : memref<1x1xf32, #tpu.memory_space<vmem>>, vector<1x1xf32>,
      %cst_25 = arith.constant 0.000000e+00 : f32
      %44 = vector.broadcast %cst_25 : f32 to vector<1x1xf32>
      %c0_26 = arith.constant 0 : index
      %c0_27 = arith.constant 0 : index
      %45 = vector.load %arg6[%c0_26, %c0_27] : memref<1x1xf32, #tpu.memory_space<vmem>>, vector<1x1xf32>
      tpu.vector_store %arg6[%c0_26, %c0_27], %44 {strides = array<i32>} : memref<1x1xf32, #tpu.memory_space<vmem>>, vector<1x1xf32>,
    } else {
    }
    %c0 = arith.constant 0 : index
    %c0_1 = arith.constant 0 : index
    %3 = vector.load %arg1[%c0, %c0_1] : memref<8x32xf32, #tpu.memory_space<vmem>>, vector<8x32xf32>
    %c0_2 = arith.constant 0 : index
    %c0_3 = arith.constant 0 : index
    %4 = vector.load %arg2[%c0_2, %c0_3] : memref<8x1xi32, #tpu.memory_space<vmem>>, vector<8x1xi32>
    %c0_4 = arith.constant 0 : index
    %c0_5 = arith.constant 0 : index
    %5 = vector.load %arg3[%c0_4, %c0_5] : memref<1x32xf32, #tpu.memory_space<vmem>>, vector<1x32xf32>
    %cst = arith.constant dense<0xFF800000> : vector<8xf32>
    %6 = vector.multi_reduction <maximumf>, %3, %cst [1] : vector<8x32xf32> to vector<8xf32>
    %7 = vector.shape_cast %6 : vector<8xf32> to vector<8x1xf32>
    %8 = vector.broadcast %7 : vector<8x1xf32> to vector<8x32xf32>
    %9 = arith.subf %3, %8 : vector<8x32xf32>
    %10 = math.exp %9 : vector<8x32xf32>
    %cst_6 = arith.constant dense<0.000000e+00> : vector<8xf32>
    %11 = vector.multi_reduction <add>, %10, %cst_6 [1] : vector<8x32xf32> to vector<8xf32>
    %12 = vector.shape_cast %11 : vector<8xf32> to vector<8x1xf32>
    %13 = math.log %12 : vector<8x1xf32>
    %14 = arith.addf %7, %13 : vector<8x1xf32>
    %15 = tpu.iota {dimensions = array<i32: 1>} : vector<8x32xi32>
    %16 = vector.broadcast %4 : vector<8x1xi32> to vector<8x32xi32>
    %17 = arith.cmpi eq, %15, %16 : vector<8x32xi32>
    %cst_7 = arith.constant 0.000000e+00 : f32
    %18 = vector.shape_cast %5 : vector<1x32xf32> to vector<1x32xf32>
    %19 = vector.broadcast %18 : vector<1x32xf32> to vector<8x32xf32>
    %20 = vector.broadcast %cst_7 : f32 to vector<8x32xf32>
    %21 = arith.select %17, %19, %20 : vector<8x32xi1>, vector<8x32xf32>
    %22 = vector.broadcast %14 : vector<8x1xf32> to vector<8x32xf32>
    %23 = arith.subf %22, %3 : vector<8x32xf32>
    %24 = arith.mulf %21, %23 : vector<8x32xf32>
    %cst_8 = arith.constant dense<0.000000e+00> : vector<8xf32>
    %25 = vector.multi_reduction <add>, %24, %cst_8 [1] : vector<8x32xf32> to vector<8xf32>
    %26 = vector.shape_cast %25 : vector<8xf32> to vector<8x1xf32>
    %cst_9 = arith.constant dense<0.000000e+00> : vector<8xf32>
    %27 = vector.multi_reduction <add>, %21, %cst_9 [1] : vector<8x32xf32> to vector<8xf32>
    %28 = vector.shape_cast %27 : vector<8xf32> to vector<8x1xf32>
    %c0_10 = arith.constant 0 : index
    %c0_11 = arith.constant 0 : index
    %29 = vector.load %arg5[%c0_10, %c0_11] : memref<1x1xf32, #tpu.memory_space<vmem>>, vector<1x1xf32>
    %cst_12 = arith.constant dense<0.000000e+00> : vector<1xf32>
    %30 = vector.multi_reduction <add>, %26, %cst_12 [0] : vector<8x1xf32> to vector<1xf32>
    %31 = vector.shape_cast %30 : vector<1xf32> to vector<1x1xf32>
    %32 = arith.addf %29, %31 : vector<1x1xf32>
    %c0_13 = arith.constant 0 : index
    %c0_14 = arith.constant 0 : index
    %33 = vector.load %arg5[%c0_13, %c0_14] : memref<1x1xf32, #tpu.memory_space<vmem>>, vector<1x1xf32>
    tpu.vector_store %arg5[%c0_13, %c0_14], %32 {strides = array<i32>} : memref<1x1xf32, #tpu.memory_space<vmem>>, vector<1x1xf32>,
    %c0_15 = arith.constant 0 : index
    %c0_16 = arith.constant 0 : index
    %34 = vector.load %arg6[%c0_15, %c0_16] : memref<1x1xf32, #tpu.memory_space<vmem>>, vector<1x1xf32>
    %cst_17 = arith.constant dense<0.000000e+00> : vector<1xf32>
    %35 = vector.multi_reduction <add>, %28, %cst_17 [0] : vector<8x1xf32> to vector<1xf32>
    %36 = vector.shape_cast %35 : vector<1xf32> to vector<1x1xf32>
    %37 = arith.addf %34, %36 : vector<1x1xf32>
    %c0_18 = arith.constant 0 : index
    %c0_19 = arith.constant 0 : index
    %38 = vector.load %arg6[%c0_18, %c0_19] : memref<1x1xf32, #tpu.memory_space<vmem>>, vector<1x1xf32>
    tpu.vector_store %arg6[%c0_18, %c0_19], %37 {strides = array<i32>} : memref<1x1xf32, #tpu.memory_space<vmem>>, vector<1x1xf32>,
    %c0_i32_20 = arith.constant 0 : i32
    %39 = arith.cmpi eq, %arg0, %c0_i32_20 : i32
    %40 = arith.extui %39 : i1 to i32
    %c0_i32_21 = arith.constant 0 : i32
    %41 = arith.cmpi ne, %40, %c0_i32_21 : i32
    scf.if %41 {
      %c0_22 = arith.constant 0 : index
      %c0_23 = arith.constant 0 : index
      %42 = vector.load %arg5[%c0_22, %c0_23] : memref<1x1xf32, #tpu.memory_space<vmem>>, vector<1x1xf32>
      %c0_24 = arith.constant 0 : index
      %c0_25 = arith.constant 0 : index
      %43 = vector.load %arg6[%c0_24, %c0_25] : memref<1x1xf32, #tpu.memory_space<vmem>>, vector<1x1xf32>
      %44 = arith.divf %42, %43 : vector<1x1xf32>
      %c0_26 = arith.constant 0 : index
      %c0_27 = arith.constant 0 : index
      %45 = vector.load %arg4[%c0_26, %c0_27] : memref<1x1xf32, #tpu.memory_space<vmem>>, vector<1x1xf32>
      tpu.vector_store %arg4[%c0_26, %c0_27], %44 {strides = array<i32>} : memref<1x1xf32, #tpu.memory_space<vmem>>, vector<1x1xf32>,
    } else {
    }
    return
  }
  func.func @transform_0(%arg0: i32) -> (i32, i32) {
    %c0_i32 = arith.constant 0 : i32
    %c0_i32_0 = arith.constant 0 : i32
    return %arg0, %c0_i32 : i32, i32
  }
  func.func @transform_1(%arg0: i32) -> (i32, i32) {
    %c0_i32 = arith.constant 0 : i32
    %c0_i32_0 = arith.constant 0 : i32
    return %arg0, %c0_i32 : i32, i32
  }
  func.func @transform_2(%arg0: i32) -> (i32, i32) {
    %c0_i32 = arith.constant 0 : i32
    %c0_i32_0 = arith.constant 0 : i32
    %c0_i32_1 = arith.constant 0 : i32
    return %c0_i32, %c0_i32_0 : i32, i32
  }
  func.func @transform_3(%arg0: i32) -> (i32, i32) {
    %c0_i32 = arith.constant 0 : i32
    %c0_i32_0 = arith.constant 0 : i32
    %c0_i32_1 = arith.constant 0 : i32
    return %c0_i32, %c0_i32_0 : i32, i32
  }
}

</mosaic_0001>

<bundles_post_ra>
// kernel: tpu_custom_call.1
= control target key start
LH: loop header
LB: loop body
LE: loop exit
PB: predicated region body
PF: predicated region fallthrough
CT: control target
= control target key end

     0   :  { %vm25_vm0 = vcmask 261120   ;;  %s189_s0 = inlined_call_operand.vmem [shape: f32[8,32], index: 0, kind: input, shape index: {}]   ;;  %s190_s1 = inlined_call_operand.vmem [shape: s32[8,1], index: 1, kind: input, shape index: {}]   ;;  %s191_s2 = inlined_call_operand.vmem [shape: f32[1,32], index: 2, kind: input, shape index: {}]   ;;  %s192_s3 = inlined_call_operand.hbm [shape: f32[1,1], index: 3, kind: output, shape index: {}]  }
   0x1   :  { %v22_v0 = vld [vmem:[%s189_s0] sm:$0xff] }
   0x2   :  { %8 = vsyncpa [#allocation5], 0  ;;  %v26_v1 = vsel %vm25_vm0, %v22_v0, -inf  ;;  %v23_v2 = vld [vmem:[%s190_s1] sm:$0xff]  ;;  %v136_v3 = vmov 0   ;;  %v38_v9 = vlaneseq  ;;  %vm19_vm2 = vcmask 0  }
   0x3   :  { %27 = vmax.xlane.f32.xlu0 %v26_v1  ;;  %104 = vset.pattern.permute.xlu1 %v136_v3  ;;  %v100_v12 = vld [vmem:[%s191_s2] ss:$0 sm:$0xff]  ;;  %v137_v15 = vmov 0.0   ;;  %s138_s1 = smov [#allocation4]  }
   0x4   :  { %105 = vset.pattern.permute.xlu0 %v136_v3  ;;  %41 = vperm.xlu1 %104, %v23_v2   ;;  %v39_v10 = vand.u32 127, %v38_v9  ;;  %21 = vst.msk [vmem:[#allocation3] sm:$0x1] %vm19_vm2, %v137_v15  ;;  %20 = vst.msk [vmem:[#allocation2] sm:$0x1] %vm19_vm2, %v137_v15  ;;  %s92_s2 = sshll.u32 %s138_s1, 4  ;;  %s93_s2 = int_to_ptr.vmem [resolvable:$true] %s92_s2 }
   0x5   :  { %s112_s17 = scalar_lea.vmem %s93_s2, 16  ;;  %s116_s18 = scalar_lea.vmem %s93_s2, 32 }
   0x6   :  { %p113_p0 = scmp.ne.s32.totalorder %s93_s2, %s112_s17  ;;  %p117_p1 = scmp.lt.s32.totalorder %s93_s2, %s93_s2 }
   0x7   :  { %p118_p2 = scmp.lt.s32.totalorder %s116_s18, %s112_s17 }
   0x9   :  { %p119_p3 = por %p118_p2, %p117_p1 }
   0xb   :  { %v69_v29 = vld [vmem:[#allocation3] sm:$0x1]  ;;  %v59_v39 = vld [vmem:[#allocation2] sm:$0x1]  ;;  %p120_p4 = pnand %p119_p3, %p113_p0 }
  0x83   :  { %v42_v11 = vpop.permute.xlu1 %41 }
  0x84   :  { %vm43_vm1 = vcmp.eq.s32.totalorder %v39_v10, %v42_v11 }
  0x85   :  { %v50_v13 = vsel %vm43_vm1, %v100_v12, 0.0 }
  0x86   :  { %v56_v14 = vsel %vm25_vm0, %v50_v13, 0.0 }
  0x87   :  { %57 = vadd.xlane.f32.xlu1 %v56_v14 }
  0x90   :  { %v28_v4 = vpop.xlane.xlu0 %27 }
  0x91   :  { %v29_v5 = vsub.f32 %v22_v0, %v28_v4 }
  0x93   :  { %v30_v6 = vmul.f32 1.442695, %v29_v5 }
  0x95   :  { %106 = vpow2.f32 %v30_v6 }
  0x9f   :  { %v107_v7 = vpop.eup %106 }
  0xa0   :  { %v32_v8 = vsel %vm25_vm0, %v107_v7, 0.0 }
  0xa1   :  { %33 = vadd.xlane.f32.xlu0 %v32_v8 }
 0x114   :  { %v58_v21 = vpop.xlane.xlu1 %57 }
 0x115   :  { %v70_v23 = vrot.slane %v58_v21, 4 }
 0x117   :  { %v71_v25 = vadd.f32 %v70_v23, %v58_v21 }
 0x119   :  { %v72_v26 = vrot.slane %v71_v25, 2 }
 0x11b   :  { %v73_v27 = vadd.f32 %v72_v26, %v71_v25 }
 0x11d   :  { %v74_v28 = vrot.slane %v73_v27, 1 }
 0x11f   :  { %v75_v30 = vadd.f32 %v74_v28, %v73_v27 }
 0x121   :  { %v76_v31 = vadd.f32 %v75_v30, %v69_v29 }
 0x123   :  { %77 = vst.msk [vmem:[#allocation3] sm:$0x1] %vm19_vm2, %v76_v31 }
 0x12a   :  { %v82_v38 = vld [vmem:[#allocation3] sm:$0x1] }
 0x12e   :  { %v34_v16 = vpop.xlane.xlu0 %33 }
 0x12f   :  { %108 = vlog2.f32 %v34_v16 }
 0x130   :  { %110 = vrcp.f32 %v82_v38 }
 0x139   :  { %v109_v17 = vpop.eup %108 }
 0x13a   :  { %v36_v18 = vmul.f32 0.6931472, %v109_v17  ;;  %v111_v42 = vpop.eup %110 }
 0x13c   :  { %v37_v19 = vadd.f32 %v36_v18, %v28_v4 }
 0x13e   :  { %v51_v20 = vsub.f32 %v37_v19, %v22_v0 }
 0x140   :  { %v52_v22 = vmul.f32 %v51_v20, %v50_v13 }
 0x142   :  { %v53_v24 = vsel %vm25_vm0, %v52_v22, 0.0 }
 0x143   :  { %54 = vadd.xlane.f32.xlu0 %v53_v24 }
 0x1d0   :  { %v55_v32 = vpop.xlane.xlu0 %54 }
 0x1d1   :  { %v60_v33 = vrot.slane %v55_v32, 4 }
 0x1d3   :  { %v61_v34 = vadd.f32 %v60_v33, %v55_v32 }
 0x1d5   :  { %v62_v35 = vrot.slane %v61_v34, 2 }
 0x1d7   :  { %v63_v36 = vadd.f32 %v62_v35, %v61_v34 }
 0x1d9   :  { %v64_v37 = vrot.slane %v63_v36, 1 }
 0x1db   :  { %v65_v40 = vadd.f32 %v64_v37, %v63_v36 }
 0x1dd   :  { %v66_v41 = vadd.f32 %v65_v40, %v59_v39 }
 0x1df   :  { %68 = vst.msk [vmem:[#allocation2] sm:$0x1] %vm19_vm2, %v66_v41 }
 0x1e6   :  { %v81_v43 = vld [vmem:[#allocation2] sm:$0x1] }
 0x1e7   :  { %v84_v44 = vmul.f32 %v111_v42, %v81_v43 }
 0x1e9   :  { %85 = vst.msk [vmem:[#allocation4] sm:$0x1] %vm19_vm2, %v84_v44 }
 0x1ea   :  { %123 = shalt.err (!%p120_p4)
}
 0x1eb   :  { %s124_s21 = scalar_lea.hbm %s192_s3, 16 }
 0x1ec   :  { %p125_p5 = scmp.ne.s32.totalorder %s192_s3, %s124_s21  ;;  %p128_p6 = scmp.lt.u32.totalorder %s124_s21, %s192_s3 }
 0x1ee   :  { %p130_p7 = pnand %p128_p6, %p125_p5 }
 0x1f0   :  { %133 = shalt.err (!%p130_p7)
}
 0x1f1   :  { %95 = dma.vmem_to_hbm [thread:$0]  %s93_s2, 16, %s192_s3, [#allocation5]  }
 0x1f2   :  { %134 = dma.done.wait [#allocation5], 16  }
 0x1f3   :  { %135 = vsyncadd [#allocation5], 4294967280 }
 0x1f4   :  { %99 = vsyncpa [#allocation5], 1 }

</bundles_post_ra>
